<compile_context>
chip_gen: v6e
topology: v6e:2x2x1
jax: 0.10.0
libtpu: 0.0.40
codegen_flags: <defaults>
</compile_context>

<pallas_src>
import math

import numpy as np
import jax
import jax.numpy as jnp
from jax import lax
from jax.experimental import pallas as pl
from jax.experimental.pallas import tpu as pltpu


_MASK_VALUE = -1e30  # large finite negative: safe under tiling (no -inf - -inf NaN)


# ----------------------------- kernel helpers -----------------------------

def _layernorm(x, gamma, beta, eps=1e-5):
    mu = jnp.mean(x, axis=-1, keepdims=True)
    xc = x - mu
    var = jnp.mean(xc * xc, axis=-1, keepdims=True)
    inv = lax.rsqrt(var + eps)
    return xc * inv * gamma + beta


def _gelu_tanh(x):
    # TODO(synk): torch nn.GELU() default is the exact erf form; tanh approx is
    # used for robust Mosaic lowering (EUP tanh).  Small systematic deviation.
    c = math.sqrt(2.0 / math.pi)
    return 0.5 * x * (1.0 + jnp.tanh(c * (x + 0.044715 * x * x * x)))


def _seq_tile(T, target):
    """Largest nice sequence tile (multiple of 8) that divides T, capped at target."""
    if T <= target:
        return T
    for cand in (target, 512, 256, 128, 64, 32, 16, 8):
        if cand <= target and T % cand == 0:
            return cand
    return T


def _ff_tile(d_ff, target):
    """Largest multiple-of-128 FF chunk <= target that divides d_ff."""
    if d_ff <= target:
        return d_ff
    t = (target // 128) * 128
    while t >= 128:
        if d_ff % t == 0:
            return t
        t -= 128
    return d_ff


def _resident(arr):
    """Whole-array BlockSpec, constant index_map, single-buffered (weight stays
    resident; Buffered(1) halves its VMEM footprint vs the default double buffer)."""
    nd = arr.ndim
    return pl.BlockSpec(arr.shape, lambda *_: (0,) * nd,
                        pipeline_mode=pl.Buffered(1))


def _pick_vmem_limit():
    """Generation-aware VMEM budget (~85% of physical, capped at 112 MiB),
    falling back to a conservative 48 MiB if hardware info is unavailable."""
    try:
        cap = getattr(pltpu.get_tpu_info(), "vmem_capacity_bytes", None)
    except Exception:
        cap = None
    if not cap:
        return 48 * 1024 * 1024
    return int(min(cap * 0.85, 112 * 1024 * 1024))


# ----------------------- kernel A: preLN + QKV projection -------------------

def qkv_proj_kernel(x_ref, g_ref, bln_ref,
                    wq_ref, wk_ref, wv_ref,
                    bq_ref, bk_ref, bv_ref,
                    q_ref, k_ref, v_ref):
    TS = x_ref.shape[1]
    H = q_ref.shape[1]
    hd = q_ref.shape[3]

    x = x_ref[0].astype(jnp.float32)                      # (TS, D)
    h = _layernorm(x, g_ref[0], bln_ref[0]).astype(wq_ref.dtype)

    def proj(w_ref, b_ref, out_ref):
        y = jnp.dot(h, w_ref[...], preferred_element_type=jnp.float32) + b_ref[0]
        # (TS, D) -> (H, TS, hd): head-batched layout for the attention kernel.
        # TODO(synk): when hd == 128 emit (B, T, H, hd) instead (layout-preserving
        # reshape, no cross-lane transpose) and select heads via kernel B BlockSpec.
        out_ref[0] = jnp.transpose(y.reshape(TS, H, hd), (1, 0, 2)).astype(out_ref.dtype)

    proj(wq_ref, bq_ref, q_ref)
    proj(wk_ref, bk_ref, k_ref)
    proj(wv_ref, bv_ref, v_ref)


# ------------- kernel B: causal flash attention on a triangular grid --------

def flash_attn_kernel(qt_ref, kt_ref, q_ref, k_ref, v_ref, o_ref,
                      m_sc, l_sc, acc_sc):
    H = q_ref.shape[1]
    TQ = q_ref.shape[2]
    hd = q_ref.shape[3]
    TK = k_ref.shape[2]

    s_idx = pl.program_id(1)
    qi = qt_ref[s_idx]
    ki = kt_ref[s_idx]

    @pl.when(ki == 0)
    def _init():
        m_sc[...] = jnp.full(m_sc.shape, -jnp.inf, dtype=m_sc.dtype)
        l_sc[...] = jnp.zeros(l_sc.shape, dtype=l_sc.dtype)
        acc_sc[...] = jnp.zeros(acc_sc.shape, dtype=acc_sc.dtype)

    q = q_ref[0]                                           # (H, TQ, hd), scale pre-folded
    k = k_ref[0]                                           # (H, TK, hd)
    v = v_ref[0]                                           # (H, TK, hd)

    # Every step of the triangular grid contributes (ki <= qi always).
    s = jnp.einsum("hqd,hkd->hqk", q, k, preferred_element_type=jnp.float32)

    def online_update(scores):
        m_prev = m_sc[...]                                 # (H, TQ, 1)
        m_new = jnp.maximum(m_prev, jnp.max(scores, axis=-1, keepdims=True))
        alpha = jnp.exp(m_prev - m_new)
        p = jnp.exp(scores - m_new)                        # (H, TQ, TK) f32
        l_sc[...] = alpha * l_sc[...] + jnp.sum(p, axis=-1, keepdims=True)
        acc_sc[...] = alpha * acc_sc[...] + jnp.einsum(
            "hqk,hkd->hqd", p.astype(v.dtype), v, preferred_element_type=jnp.float32)
        m_sc[...] = m_new

    @pl.when(ki < qi)        # strictly below the diagonal: no mask needed
    def _off_diag():
        online_update(s)

    @pl.when(ki == qi)       # diagonal tile (TQ == TK): triangular mask
    def _diag():
        row = lax.broadcasted_iota(jnp.int32, (TQ, TK), 0)
        col = lax.broadcasted_iota(jnp.int32, (TQ, TK), 1)
        online_update(jnp.where((row >= col)[None, :, :], s, _MASK_VALUE))

    @pl.when(ki == qi)       # last contributing KV tile for this q tile: finalize
    def _finalize():
        o = acc_sc[...] * pl.reciprocal(l_sc[...], approx=False)   # (H, TQ, hd)
        # Back to lane-dense (TQ, D) layout for kernel C (once per output tile).
        o_ref[0] = jnp.transpose(o, (1, 0, 2)).reshape(TQ, H * hd).astype(o_ref.dtype)


# ------- kernel C: output projection + postLN + MLP (d_ff tiled) ------------

def proj_mlp_kernel(a_ref, wo_ref, bo_ref, g_ref, bln_ref,
                    w1_ref, b1_ref, w2_ref, b2_ref, o_ref, h_sc, acc_sc):
    f = pl.program_id(2)
    nf = pl.num_programs(2)

    @pl.when(f == 0)
    def _head():
        a = a_ref[0]                                        # (TS, D) compute dtype
        y = jnp.dot(a, wo_ref[...], preferred_element_type=jnp.float32) + bo_ref[0]
        h = _layernorm(y, g_ref[0], bln_ref[0])
        h_sc[...] = h.astype(h_sc.dtype)
        acc_sc[...] = jnp.zeros(acc_sc.shape, dtype=acc_sc.dtype)

    # One FF chunk: (TS, D) @ (D, FT) -> GELU -> (FT, D) accumulated in f32.
    ff = jnp.dot(h_sc[...], w1_ref[...], preferred_element_type=jnp.float32) + b1_ref[0]
    ff = _gelu_tanh(ff).astype(w2_ref.dtype)
    acc_sc[...] += jnp.dot(ff, w2_ref[...], preferred_element_type=jnp.float32)

    @pl.when(f == nf - 1)
    def _tail():
        o_ref[0] = (acc_sc[...] + b2_ref[0]).astype(o_ref.dtype)


# --------------------------------- wrapper ---------------------------------

def kitty_block(x, params, n_head, *, compute_dtype=jnp.float32,
                seq_tile=256, ff_tile=512, vmem_limit_bytes=None):
    (g1, b1ln, wqkv, bqkv, wo, bo, g2, b2ln, w1, b1, w2, b2) = params
    B, T, D = x.shape
    assert D % n_head == 0
    hd = D // n_head
    d_ff = w1.shape[1]

    TS = _seq_tile(T, seq_tile)
    assert T % TS == 0
    nq = T // TS

    FT = _ff_tile(d_ff, ff_tile)
    assert d_ff % FT == 0
    nf = d_ff // FT

    if vmem_limit_bytes is None:
        vmem_limit_bytes = _pick_vmem_limit()

    # Split fused QKV weight; fold the 1/sqrt(hd) attention scale into Wq/bq
    # (removes a per-KV-step multiply in the attention kernel).  Cast matmul
    # weights to compute_dtype (bf16 on v6e/v7x) for MXU operands; LN/softmax/
    # GELU math stays f32.
    scale = 1.0 / math.sqrt(hd)
    wq, wk, wv = jnp.split(wqkv, 3, axis=1)
    bq, bk, bv = jnp.split(bqkv, 3, axis=1)
    wq = (wq * scale).astype(compute_dtype)
    bq = bq * scale
    wk = wk.astype(compute_dtype)
    wv = wv.astype(compute_dtype)
    wo_c = wo.astype(compute_dtype)
    w1_c = w1.astype(compute_dtype)
    w2_c = w2.astype(compute_dtype)
    # TODO(synk): at very large D, stream wq/wk/wv over an output-column grid axis
    # (or keep them in HBM with pl.ANY + emit_pipeline) instead of fully resident.

    # ---- kernel A: preLN + QKV projection, tiled over (B, T//TS) ----
    q, k, v = pl.pallas_call(
        qkv_proj_kernel,
        out_shape=[jax.ShapeDtypeStruct((B, n_head, T, hd), compute_dtype)
                   for _ in range(3)],
        grid_spec=pltpu.PrefetchScalarGridSpec(
            num_scalar_prefetch=0,
            grid=(B, nq),
            in_specs=[
                pl.BlockSpec((1, TS, D), lambda b, t: (b, t, 0)),
                _resident(g1), _resident(b1ln),
                _resident(wq), _resident(wk), _resident(wv),
                _resident(bq), _resident(bk), _resident(bv),
            ],
            out_specs=[pl.BlockSpec((1, n_head, TS, hd), lambda b, t: (b, 0, t, 0))
                       for _ in range(3)],
        ),
        compiler_params=pltpu.CompilerParams(
            dimension_semantics=("parallel", "parallel"),
            vmem_limit_bytes=vmem_limit_bytes),
    )(x, g1, b1ln, wq, wk, wv, bq, bk, bv)

    # ---- kernel B: causal flash attention on a lower-triangular grid ----
    # Flat step s -> (qi_tab[s], ki_tab[s]); only ki <= qi tiles exist, so no
    # grid step or K/V DMA is ever spent on a fully-masked tile.
    steps = [(qi_, ki_) for qi_ in range(nq) for ki_ in range(qi_ + 1)]
    qi_tab = jnp.asarray([s_[0] for s_ in steps], dtype=jnp.int32)
    ki_tab = jnp.asarray([s_[1] for s_ in steps], dtype=jnp.int32)
    n_steps = len(steps)

    attn = pl.pallas_call(
        flash_attn_kernel,
        out_shape=jax.ShapeDtypeStruct((B, T, D), compute_dtype),
        grid_spec=pltpu.PrefetchScalarGridSpec(
            num_scalar_prefetch=2,
            grid=(B, n_steps),
            in_specs=[
                pl.BlockSpec((1, n_head, TS, hd),
                             lambda b, s, qt, kt: (b, 0, qt[s], 0)),
                pl.BlockSpec((1, n_head, TS, hd),
                             lambda b, s, qt, kt: (b, 0, kt[s], 0)),
                pl.BlockSpec((1, n_head, TS, hd),
                             lambda b, s, qt, kt: (b, 0, kt[s], 0)),
            ],
            out_specs=pl.BlockSpec((1, TS, D), lambda b, s, qt, kt: (b, qt[s], 0)),
            scratch_shapes=[
                pltpu.VMEM((n_head, TS, 1), jnp.float32),   # running max m
                pltpu.VMEM((n_head, TS, 1), jnp.float32),   # running denom l
                pltpu.VMEM((n_head, TS, hd), jnp.float32),  # output accumulator
            ],
        ),
        compiler_params=pltpu.CompilerParams(
            dimension_semantics=("parallel", "arbitrary"),
            vmem_limit_bytes=vmem_limit_bytes),
    )(qi_tab, ki_tab, q, k, v)

    # ---- kernel C: Wo proj + postLN + MLP, tiled over (B, T//TS, d_ff//FT) ----
    out = pl.pallas_call(
        proj_mlp_kernel,
        out_shape=jax.ShapeDtypeStruct((B, T, D), x.dtype),
        grid_spec=pltpu.PrefetchScalarGridSpec(
            num_scalar_prefetch=0,
            grid=(B, nq, nf),
            in_specs=[
                pl.BlockSpec((1, TS, D), lambda b, t, f: (b, t, 0)),
                _resident(wo_c), _resident(bo),
                _resident(g2), _resident(b2ln),
                pl.BlockSpec((D, FT), lambda b, t, f: (0, f)),   # w1 FF chunk
                pl.BlockSpec((1, FT), lambda b, t, f: (0, f)),   # b1 FF chunk
                pl.BlockSpec((FT, D), lambda b, t, f: (f, 0)),   # w2 FF chunk
                _resident(b2),
            ],
            out_specs=pl.BlockSpec((1, TS, D), lambda b, t, f: (b, t, 0)),
            scratch_shapes=[
                pltpu.VMEM((TS, D), compute_dtype),   # postLN activations (reused per FF chunk)
                pltpu.VMEM((TS, D), jnp.float32),     # MLP output accumulator
            ],
        ),
        compiler_params=pltpu.CompilerParams(
            dimension_semantics=("parallel", "parallel", "arbitrary"),
            vmem_limit_bytes=vmem_limit_bytes),
    )(attn, wo_c, bo, g2, b2ln, w1_c, b1, w2_c, b2)

    return out


# ----------------------------- pure-JAX reference ---------------------------

def kitty_block_ref(x, params, n_head, compute_dtype=jnp.float32):
    (g1, b1ln, wqkv, bqkv, wo, bo, g2, b2ln, w1, b1, w2, b2) = params
    B, T, D = x.shape
    hd = D // n_head
    cd = compute_dtype
    prec = jax.lax.Precision.HIGHEST

    def mm(a, w):
        return jnp.dot(a.astype(cd), w.astype(cd),
                       preferred_element_type=jnp.float32, precision=prec)

    h = _layernorm(x.astype(jnp.float32), g1[0], b1ln[0])
    qkv = mm(h, wqkv) + bqkv[0]
    q, k, v = jnp.split(qkv, 3, axis=-1)

    def heads(t):  # (B,T,D) -> (B,H,T,hd)
        return t.reshape(B, T, n_head, hd).transpose(0, 2, 1, 3)

    qh, kh, vh = heads(q), heads(k), heads(v)
    s = jnp.einsum("bhqd,bhkd->bhqk", qh.astype(cd), kh.astype(cd),
                   preferred_element_type=jnp.float32,
                   precision=prec) / math.sqrt(hd)
    mask = jnp.tril(jnp.ones((T, T), bool))
    s = jnp.where(mask, s, -jnp.inf)
    p = jax.nn.softmax(s, axis=-1)
    o = jnp.einsum("bhqk,bhkd->bhqd", p.astype(cd), vh.astype(cd),
                   preferred_element_type=jnp.float32, precision=prec)
    o = o.transpose(0, 2, 1, 3).reshape(B, T, D)
    o = mm(o, wo) + bo[0]
    h2 = _layernorm(o, g2[0], b2ln[0])
    ff = _gelu_tanh(mm(h2, w1) + b1[0])
    return (mm(ff, w2) + b2[0]).astype(x.dtype)


# ----------------------------------- main -----------------------------------

if __name__ == "__main__":
    # Small but non-trivial: multiple sequence tiles (triangular attention grid,
    # masked diagonal + unmasked off-diagonal paths) and multiple FF chunks.
    B, T, D, n_head = 2, 32, 64, 4
    d_ff = 4 * D

    key = jax.random.PRNGKey(0)
    ks = jax.random.split(key, 12)

    x = jax.random.normal(ks[0], (B, T, D), jnp.float32)

    params = (
        1.0 + 0.1 * jax.random.normal(ks[1], (1, D), jnp.float32),      # preln gamma
        0.1 * jax.random.normal(ks[2], (1, D), jnp.float32),            # preln beta
        0.02 * jax.random.normal(ks[3], (D, 3 * D), jnp.float32),       # W_qkv
        0.02 * jax.random.normal(ks[4], (1, 3 * D), jnp.float32),       # b_qkv
        0.02 * jax.random.normal(ks[5], (D, D), jnp.float32),           # W_o
        0.02 * jax.random.normal(ks[6], (1, D), jnp.float32),           # b_o
        1.0 + 0.1 * jax.random.normal(ks[7], (1, D), jnp.float32),      # postln gamma
        0.1 * jax.random.normal(ks[8], (1, D), jnp.float32),            # postln beta
        0.02 * jax.random.normal(ks[9], (D, d_ff), jnp.float32),        # W_fc
        0.02 * jax.random.normal(ks[10], (1, d_ff), jnp.float32),       # b_fc
        0.02 * jax.random.normal(ks[11], (d_ff, D), jnp.float32),       # W_proj
        jnp.zeros((1, D), jnp.float32),                                 # b_proj
    )

    # f32 compute path (tight check vs pure-JAX reference).
    out_f32 = jax.block_until_ready(
        kitty_block(x, params, n_head, compute_dtype=jnp.float32,
                    seq_tile=16, ff_tile=128))
    ref_f32 = jax.block_until_ready(
        kitty_block_ref(x, params, n_head, jnp.float32))
    np.testing.assert_allclose(np.asarray(out_f32), np.asarray(ref_f32),
                               rtol=5e-3, atol=5e-4)

    # bf16 MXU path (v6e/v7x recommendation), checked against a bf16-mirroring ref.
    out_bf16 = jax.block_until_ready(
        kitty_block(x, params, n_head, compute_dtype=jnp.bfloat16,
                    seq_tile=16, ff_tile=128))
    ref_bf16 = jax.block_until_ready(
        kitty_block_ref(x, params, n_head, jnp.bfloat16))
    np.testing.assert_allclose(np.asarray(out_bf16), np.asarray(ref_bf16),
                               rtol=5e-2, atol=1e-2)

    print("KERNEL_OK")
</pallas_src>

<mosaic_0001>
module attributes {stable_mosaic.version = 11 : i64} {
  func.func @qkv_proj_kernel(%arg0: i32, %arg1: i32, %arg2: memref<1x16x64xf32, #tpu.memory_space<vmem>>, %arg3: memref<1x64xf32, #tpu.memory_space<vmem>>, %arg4: memref<1x64xf32, #tpu.memory_space<vmem>>, %arg5: memref<64x64xf32, #tpu.memory_space<vmem>>, %arg6: memref<64x64xf32, #tpu.memory_space<vmem>>, %arg7: memref<64x64xf32, #tpu.memory_space<vmem>>, %arg8: memref<1x64xf32, #tpu.memory_space<vmem>>, %arg9: memref<1x64xf32, #tpu.memory_space<vmem>>, %arg10: memref<1x64xf32, #tpu.memory_space<vmem>>, %arg11: memref<1x4x16x16xf32, #tpu.memory_space<vmem>>, %arg12: memref<1x4x16x16xf32, #tpu.memory_space<vmem>>, %arg13: memref<1x4x16x16xf32, #tpu.memory_space<vmem>>) attributes {dimension_semantics = [#tpu.dimension_semantics<parallel>, #tpu.dimension_semantics<parallel>], iteration_bounds = array<i64: 2, 2>, scalar_prefetch = 0 : i64, scratch_operands = 0 : i64, tpu.core_type = #tpu.core_type<tc>, window_params = [{transform_indices = @transform_0, window_bounds = array<i64: 1, 16, 64>}, {pipeline_mode = #tpu.pipeline_mode<synchronous>, transform_indices = @transform_1, window_bounds = array<i64: 1, 64>}, {pipeline_mode = #tpu.pipeline_mode<synchronous>, transform_indices = @transform_2, window_bounds = array<i64: 1, 64>}, {pipeline_mode = #tpu.pipeline_mode<synchronous>, transform_indices = @transform_3, window_bounds = array<i64: 64, 64>}, {pipeline_mode = #tpu.pipeline_mode<synchronous>, transform_indices = @transform_4, window_bounds = array<i64: 64, 64>}, {pipeline_mode = #tpu.pipeline_mode<synchronous>, transform_indices = @transform_5, window_bounds = array<i64: 64, 64>}, {pipeline_mode = #tpu.pipeline_mode<synchronous>, transform_indices = @transform_6, window_bounds = array<i64: 1, 64>}, {pipeline_mode = #tpu.pipeline_mode<synchronous>, transform_indices = @transform_7, window_bounds = array<i64: 1, 64>}, {pipeline_mode = #tpu.pipeline_mode<synchronous>, transform_indices = @transform_8, window_bounds = array<i64: 1, 64>}, {transform_indices = @transform_9, window_bounds = array<i64: 1, 4, 16, 16>}, {transform_indices = @transform_10, window_bounds = array<i64: 1, 4, 16, 16>}, {transform_indices = @transform_11, window_bounds = array<i64: 1, 4, 16, 16>}]} {
    %c0 = arith.constant 0 : index
    %c0_0 = arith.constant 0 : index
    %c0_1 = arith.constant 0 : index
    %0 = vector.load %arg2[%c0, %c0_0, %c0_1] : memref<1x16x64xf32, #tpu.memory_space<vmem>>, vector<1x16x64xf32>
    %1 = vector.shape_cast %0 : vector<1x16x64xf32> to vector<16x64xf32>
    %c0_2 = arith.constant 0 : index
    %c0_3 = arith.constant 0 : index
    %2 = vector.load %arg3[%c0_2, %c0_3] : memref<1x64xf32, #tpu.memory_space<vmem>>, vector<1x64xf32>
    %3 = vector.shape_cast %2 : vector<1x64xf32> to vector<64xf32>
    %c0_4 = arith.constant 0 : index
    %c0_5 = arith.constant 0 : index
    %4 = vector.load %arg4[%c0_4, %c0_5] : memref<1x64xf32, #tpu.memory_space<vmem>>, vector<1x64xf32>
    %5 = vector.shape_cast %4 : vector<1x64xf32> to vector<64xf32>
    %cst = arith.constant dense<0.000000e+00> : vector<16xf32>
    %6 = vector.multi_reduction <add>, %1, %cst [1] : vector<16x64xf32> to vector<16xf32>
    %7 = vector.shape_cast %6 : vector<16xf32> to vector<16x1xf32>
    %cst_6 = arith.constant 6.400000e+01 : f32
    %8 = vector.broadcast %cst_6 : f32 to vector<16x1xf32>
    %9 = arith.divf %7, %8 : vector<16x1xf32>
    %10 = vector.broadcast %9 : vector<16x1xf32> to vector<16x64xf32>
    %11 = arith.subf %1, %10 : vector<16x64xf32>
    %12 = arith.mulf %11, %11 : vector<16x64xf32>
    %cst_7 = arith.constant dense<0.000000e+00> : vector<16xf32>
    %13 = vector.multi_reduction <add>, %12, %cst_7 [1] : vector<16x64xf32> to vector<16xf32>
    %14 = vector.shape_cast %13 : vector<16xf32> to vector<16x1xf32>
    %cst_8 = arith.constant 6.400000e+01 : f32
    %15 = vector.broadcast %cst_8 : f32 to vector<16x1xf32>
    %16 = arith.divf %14, %15 : vector<16x1xf32>
    %cst_9 = arith.constant 9.99999974E-6 : f32
    %17 = vector.broadcast %cst_9 : f32 to vector<16x1xf32>
    %18 = arith.addf %16, %17 : vector<16x1xf32>
    %19 = math.rsqrt %18 : vector<16x1xf32>
    %20 = vector.broadcast %19 : vector<16x1xf32> to vector<16x64xf32>
    %21 = arith.mulf %11, %20 : vector<16x64xf32>
    %22 = vector.shape_cast %3 : vector<64xf32> to vector<1x64xf32>
    %23 = vector.broadcast %22 : vector<1x64xf32> to vector<16x64xf32>
    %24 = arith.mulf %21, %23 : vector<16x64xf32>
    %25 = vector.shape_cast %5 : vector<64xf32> to vector<1x64xf32>
    %26 = vector.broadcast %25 : vector<1x64xf32> to vector<16x64xf32>
    %27 = arith.addf %24, %26 : vector<16x64xf32>
    %c0_10 = arith.constant 0 : index
    %c0_11 = arith.constant 0 : index
    %28 = vector.load %arg5[%c0_10, %c0_11] : memref<64x64xf32, #tpu.memory_space<vmem>>, vector<64x64xf32>
    %cst_12 = arith.constant dense<0.000000e+00> : vector<16x64xf32>
    %29 = tpu.matmul %27, %28, %cst_12 {dimension_numbers = #tpu.dot_dimension_numbers<[1], [0], [0], [1], [0, 0, 1, 1], [], []>} : vector<16x64xf32>, vector<64x64xf32>, vector<16x64xf32> -> vector<16x64xf32>
    %c0_13 = arith.constant 0 : index
    %c0_14 = arith.constant 0 : index
    %30 = vector.load %arg8[%c0_13, %c0_14] : memref<1x64xf32, #tpu.memory_space<vmem>>, vector<1x64xf32>
    %31 = vector.shape_cast %30 : vector<1x64xf32> to vector<64xf32>
    %32 = vector.shape_cast %31 : vector<64xf32> to vector<1x64xf32>
    %33 = vector.broadcast %32 : vector<1x64xf32> to vector<16x64xf32>
    %34 = arith.addf %29, %33 : vector<16x64xf32>
    %35 = vector.shape_cast %34 : vector<16x64xf32> to vector<16x4x16xf32>
    %36 = tpu.transpose %35, [1, 0, 2] : vector<16x4x16xf32> -> vector<4x16x16xf32>
    %c0_15 = arith.constant 0 : index
    %c0_16 = arith.constant 0 : index
    %c0_17 = arith.constant 0 : index
    %c0_18 = arith.constant 0 : index
    %37 = vector.load %arg11[%c0_15, %c0_16, %c0_17, %c0_18] : memref<1x4x16x16xf32, #tpu.memory_space<vmem>>, vector<1x4x16x16xf32>
    %38 = vector.shape_cast %37 : vector<1x4x16x16xf32> to vector<4x16x16xf32>
    %39 = vector.shape_cast %36 : vector<4x16x16xf32> to vector<1x4x16x16xf32>
    tpu.vector_store %arg11[%c0_15, %c0_16, %c0_17, %c0_18], %39 {strides = array<i32>} : memref<1x4x16x16xf32, #tpu.memory_space<vmem>>, vector<1x4x16x16xf32>,
    %c0_19 = arith.constant 0 : index
    %c0_20 = arith.constant 0 : index
    %40 = vector.load %arg6[%c0_19, %c0_20] : memref<64x64xf32, #tpu.memory_space<vmem>>, vector<64x64xf32>
    %cst_21 = arith.constant dense<0.000000e+00> : vector<16x64xf32>
    %41 = tpu.matmul %27, %40, %cst_21 {dimension_numbers = #tpu.dot_dimension_numbers<[1], [0], [0], [1], [0, 0, 1, 1], [], []>} : vector<16x64xf32>, vector<64x64xf32>, vector<16x64xf32> -> vector<16x64xf32>
    %c0_22 = arith.constant 0 : index
    %c0_23 = arith.constant 0 : index
    %42 = vector.load %arg9[%c0_22, %c0_23] : memref<1x64xf32, #tpu.memory_space<vmem>>, vector<1x64xf32>
    %43 = vector.shape_cast %42 : vector<1x64xf32> to vector<64xf32>
    %44 = vector.shape_cast %43 : vector<64xf32> to vector<1x64xf32>
    %45 = vector.broadcast %44 : vector<1x64xf32> to vector<16x64xf32>
    %46 = arith.addf %41, %45 : vector<16x64xf32>
    %47 = vector.shape_cast %46 : vector<16x64xf32> to vector<16x4x16xf32>
    %48 = tpu.transpose %47, [1, 0, 2] : vector<16x4x16xf32> -> vector<4x16x16xf32>
    %c0_24 = arith.constant 0 : index
    %c0_25 = arith.constant 0 : index
    %c0_26 = arith.constant 0 : index
    %c0_27 = arith.constant 0 : index
    %49 = vector.load %arg12[%c0_24, %c0_25, %c0_26, %c0_27] : memref<1x4x16x16xf32, #tpu.memory_space<vmem>>, vector<1x4x16x16xf32>
    %50 = vector.shape_cast %49 : vector<1x4x16x16xf32> to vector<4x16x16xf32>
    %51 = vector.shape_cast %48 : vector<4x16x16xf32> to vector<1x4x16x16xf32>
    tpu.vector_store %arg12[%c0_24, %c0_25, %c0_26, %c0_27], %51 {strides = array<i32>} : memref<1x4x16x16xf32, #tpu.memory_space<vmem>>, vector<1x4x16x16xf32>,
    %c0_28 = arith.constant 0 : index
    %c0_29 = arith.constant 0 : index
    %52 = vector.load %arg7[%c0_28, %c0_29] : memref<64x64xf32, #tpu.memory_space<vmem>>, vector<64x64xf32>
    %cst_30 = arith.constant dense<0.000000e+00> : vector<16x64xf32>
    %53 = tpu.matmul %27, %52, %cst_30 {dimension_numbers = #tpu.dot_dimension_numbers<[1], [0], [0], [1], [0, 0, 1, 1], [], []>} : vector<16x64xf32>, vector<64x64xf32>, vector<16x64xf32> -> vector<16x64xf32>
    %c0_31 = arith.constant 0 : index
    %c0_32 = arith.constant 0 : index
    %54 = vector.load %arg10[%c0_31, %c0_32] : memref<1x64xf32, #tpu.memory_space<vmem>>, vector<1x64xf32>
    %55 = vector.shape_cast %54 : vector<1x64xf32> to vector<64xf32>
    %56 = vector.shape_cast %55 : vector<64xf32> to vector<1x64xf32>
    %57 = vector.broadcast %56 : vector<1x64xf32> to vector<16x64xf32>
    %58 = arith.addf %53, %57 : vector<16x64xf32>
    %59 = vector.shape_cast %58 : vector<16x64xf32> to vector<16x4x16xf32>
    %60 = tpu.transpose %59, [1, 0, 2] : vector<16x4x16xf32> -> vector<4x16x16xf32>
    %c0_33 = arith.constant 0 : index
    %c0_34 = arith.constant 0 : index
    %c0_35 = arith.constant 0 : index
    %c0_36 = arith.constant 0 : index
    %61 = vector.load %arg13[%c0_33, %c0_34, %c0_35, %c0_36] : memref<1x4x16x16xf32, #tpu.memory_space<vmem>>, vector<1x4x16x16xf32>
    %62 = vector.shape_cast %61 : vector<1x4x16x16xf32> to vector<4x16x16xf32>
    %63 = vector.shape_cast %60 : vector<4x16x16xf32> to vector<1x4x16x16xf32>
    tpu.vector_store %arg13[%c0_33, %c0_34, %c0_35, %c0_36], %63 {strides = array<i32>} : memref<1x4x16x16xf32, #tpu.memory_space<vmem>>, vector<1x4x16x16xf32>,
    return
  }
  func.func @transform_0(%arg0: i32, %arg1: i32) -> (i32, i32, i32) {
    %c0_i32 = arith.constant 0 : i32
    %c0_i32_0 = arith.constant 0 : i32
    return %arg0, %arg1, %c0_i32 : i32, i32, i32
  }
  func.func @transform_1(%arg0: i32, %arg1: i32) -> (i32, i32) {
    %c0_i32 = arith.constant 0 : i32
    %c0_i32_0 = arith.constant 0 : i32
    %c0_i32_1 = arith.constant 0 : i32
    return %c0_i32, %c0_i32_0 : i32, i32
  }
  func.func @transform_2(%arg0: i32, %arg1: i32) -> (i32, i32) {
    %c0_i32 = arith.constant 0 : i32
    %c0_i32_0 = arith.constant 0 : i32
    %c0_i32_1 = arith.constant 0 : i32
    return %c0_i32, %c0_i32_0 : i32, i32
  }
  func.func @transform_3(%arg0: i32, %arg1: i32) -> (i32, i32) {
    %c0_i32 = arith.constant 0 : i32
    %c0_i32_0 = arith.constant 0 : i32
    %c0_i32_1 = arith.constant 0 : i32
    return %c0_i32, %c0_i32_0 : i32, i32
  }
  func.func @transform_4(%arg0: i32, %arg1: i32) -> (i32, i32) {
    %c0_i32 = arith.constant 0 : i32
    %c0_i32_0 = arith.constant 0 : i32
    %c0_i32_1 = arith.constant 0 : i32
    return %c0_i32, %c0_i32_0 : i32, i32
  }
  func.func @transform_5(%arg0: i32, %arg1: i32) -> (i32, i32) {
    %c0_i32 = arith.constant 0 : i32
    %c0_i32_0 = arith.constant 0 : i32
    %c0_i32_1 = arith.constant 0 : i32
    return %c0_i32, %c0_i32_0 : i32, i32
  }
  func.func @transform_6(%arg0: i32, %arg1: i32) -> (i32, i32) {
    %c0_i32 = arith.constant 0 : i32
    %c0_i32_0 = arith.constant 0 : i32
    %c0_i32_1 = arith.constant 0 : i32
    return %c0_i32, %c0_i32_0 : i32, i32
  }
  func.func @transform_7(%arg0: i32, %arg1: i32) -> (i32, i32) {
    %c0_i32 = arith.constant 0 : i32
    %c0_i32_0 = arith.constant 0 : i32
    %c0_i32_1 = arith.constant 0 : i32
    return %c0_i32, %c0_i32_0 : i32, i32
  }
  func.func @transform_8(%arg0: i32, %arg1: i32) -> (i32, i32) {
    %c0_i32 = arith.constant 0 : i32
    %c0_i32_0 = arith.constant 0 : i32
    %c0_i32_1 = arith.constant 0 : i32
    return %c0_i32, %c0_i32_0 : i32, i32
  }
  func.func @transform_9(%arg0: i32, %arg1: i32) -> (i32, i32, i32, i32) {
    %c0_i32 = arith.constant 0 : i32
    %c0_i32_0 = arith.constant 0 : i32
    %c0_i32_1 = arith.constant 0 : i32
    return %arg0, %c0_i32, %arg1, %c0_i32_0 : i32, i32, i32, i32
  }
  func.func @transform_10(%arg0: i32, %arg1: i32) -> (i32, i32, i32, i32) {
    %c0_i32 = arith.constant 0 : i32
    %c0_i32_0 = arith.constant 0 : i32
    %c0_i32_1 = arith.constant 0 : i32
    return %arg0, %c0_i32, %arg1, %c0_i32_0 : i32, i32, i32, i32
  }
  func.func @transform_11(%arg0: i32, %arg1: i32) -> (i32, i32, i32, i32) {
    %c0_i32 = arith.constant 0 : i32
    %c0_i32_0 = arith.constant 0 : i32
    %c0_i32_1 = arith.constant 0 : i32
    return %arg0, %c0_i32, %arg1, %c0_i32_0 : i32, i32, i32, i32
  }
}

</mosaic_0001>

<bundles_post_ra>
// kernel: tpu_custom_call.1
= control target key start
LH: loop header
LB: loop body
LE: loop exit
PB: predicated region body
PF: predicated region fallthrough
CT: control target
= control target key end

     0   :  { %s3102_s0 = inlined_call_operand.hbm [shape: f32[2,32,64], index: 0, kind: input, shape index: {}]   ;;  %s3103_s1 = inlined_call_operand.vmem [shape: f32[1,64], index: 1, kind: input, shape index: {}]   ;;  %s3104_s2 = inlined_call_operand.vmem [shape: f32[1,64], index: 2, kind: input, shape index: {}]   ;;  %s3105_s3 = inlined_call_operand.hbm [shape: f32[64,64], index: 3, kind: input, shape index: {}]   ;;  %s3106_s4 = inlined_call_operand.hbm [shape: f32[64,64], index: 4, kind: input, shape index: {}]   ;;  %s3107_s5 = inlined_call_operand.hbm [shape: f32[64,64], index: 5, kind: input, shape index: {}]   ;;  %s3108_s6 = inlined_call_operand.vmem [shape: f32[1,64], index: 6, kind: input, shape index: {}]   ;;  %s3109_s7 = inlined_call_operand.vmem [shape: f32[1,64], index: 7, kind: input, shape index: {}]   ;;  %s3110_s8 = inlined_call_operand.vmem [shape: f32[1,64], index: 8, kind: input, shape index: {}]   ;;  %s3111_s9 = inlined_call_operand.vmem [shape: f32[2,4,32,16], index: 9, kind: output, shape index: {0}]   ;;  %s3112_s10 = inlined_call_operand.vmem [shape: f32[2,4,32,16], index: 10, kind: output, shape index: {1}]   ;;  %s3113_s11 = inlined_call_operand.vmem [shape: f32[2,4,32,16], index: 11, kind: output, shape index: {2}]  }
   0x1   :  { %3118 = sst [smem:[#allocation19_spill]] %s3105_s3 }
   0x2   :  { %3119 = sst [smem:[#allocation20_spill]] %s3106_s4 }
   0x3   :  { %3120 = sst [smem:[#allocation21_spill]] %s3107_s5 }
   0x4   :  { %3121 = sst [smem:[#allocation22_spill]] %s3109_s7 }
   0x5   :  { %3122 = sst [smem:[#allocation23_spill]] %s3110_s8 }
   0x6   :  { %3123 = sst [smem:[#allocation24_spill]] %s3111_s9 }
   0x7   :  { %3124 = sst [smem:[#allocation25_spill]] %s3112_s10 }
   0x8   :  { %3125 = sst [smem:[#allocation26_spill]] %s3113_s11 }
   0x9   :  { %17 = vsyncpa [#allocation3], 0 }
   0xa   :  { %19 = vsyncpa [#allocation3 + $0x1], 0 }
   0xb   :  { %20 = vsyncpa [#allocation5], 0 }
   0xc   :  { %21 = vsyncpa [#allocation8], 0  ;;  %s2607_s17 = smov 0   ;;  %s2609_s18 = smov 0  }
   0xd   :  { %s2611_s19 = smov 0   ;;  %s2613_s20 = smov 0  }
   0xe   :  { %s2615_s21 = smov 0   ;;  %s2617_s22 = smov 0  }
   0xf   :  { %s2619_s23 = smov 0   ;;  %s2621_s24 = smov 0  }
  0x10 LB: > { %3126 = sst [smem:[#allocation15_spill]] %s2518_s20  ;;  %s2098_s25 = sadd.s32 4294967295, %s2534_s24   ;;  %s2534_s24 = sphi %s2621_s24, %s27_s24   ;;  %s2530_s23 = sphi %s2619_s23, %s3167_s23   ;;  %s2526_s22 = sphi %s2617_s22, %s3166_s22   ;;  %s2522_s21 = sphi %s2615_s21, %s3165_s21   ;;  %s2518_s20 = sphi %s2613_s20, %s3164_s20   ;;  %s2514_s19 = sphi %s2611_s19, %s3163_s19   ;;  %s2510_s18 = sphi %s2609_s18, %s3162_s18   ;;  %s2506_s17 = sphi %s2607_s17, %s3161_s17  }
  0x11   : > { %3127 = sst [smem:[#allocation16_spill]] %s2522_s21  ;;  %p61_p0 = scmp.ne.s32.totalorder %s2510_s18, %s2506_s17 }
  0x12   : > { %p2647_p1 = scmp.eq.s32.totalorder %s2098_s25, 0  ;;  %p2651_p2 = scmp.eq.s32.totalorder %s2098_s25, 3 }
  0x13   : > { %p2100_p3 = scmp.ge.s32.totalorder %s2534_s24, 1  ;;  %p324_p4 = scmp.lt.s32.totalorder %s2534_s24, 5 }
  0x14   : > { %p2659_p5 = por %p2647_p1, %p61_p0  ;;  %s2536_s30 = smov [#allocation4]  }
  0x15   : > { %p2663_p6 = pnand %p2100_p3, %p324_p4  ;;  %s342_s12 = sshll.u32 %s2536_s30, 4  ;;  %s343_s12 = int_to_ptr.vmem [resolvable:$true] %s342_s12 }
  0x16   : > { %s2537_s14 = smov [#allocation6]   ;;  %s2365_s16 = scalar_lea.vmem %s343_s12, 1024 }
  0x17   : > { %p2255_p7 = pneg %p2663_p6  ;;  %s355_s15 = sshll.u32 %s2537_s14, 4  ;;  %s356_s15 = int_to_ptr.vmem [resolvable:$true] %s355_s15 }
  0x18   : > { %p2366_p10 = scmp.ne.s32.totalorder %s343_s12, %s2365_s16  ;;  %p2373_p13 = scmp.lt.s32.totalorder %s343_s12, %s343_s12 }
  0x19   : > { %p2671_p8 = pnand %p2255_p7, %p2647_p1  ;;  %p2374_p0 = scmp.lt.s32.totalorder %s2365_s16, %s2365_s16 }
  0x1b   : > { %p2356_p9 = pneg %p2671_p8  ;;  %p2375_p3 = por %p2374_p0, %p2373_p13 }
  0x1d   : > { %p2368_p11 = pnand %p2366_p10, %p2356_p9 }
  0x1f   : > { %p2369_p12 = pneg %p2368_p11 }
  0x21   : > { %p2376_p4 = pnand %p2375_p3, %p2369_p12 }
  0x23   : > { %2379 = shalt.err (!%p2376_p4)
}
  0x24   : > { %s3114_s17 = smov 128   ;;  %s3115_s25 = smov 8  }
  0x25   : > { %s3133_s3 = sld [smem:[#allocation19_spill]]  ;;  %s2391_s11 = scalar_lea.vmem %s356_s15, 1024 }
  0x26   : > { %p2392_p7 = scmp.ne.s32.totalorder %s356_s15, %s2391_s11  ;;  %p2399_p12 = scmp.lt.s32.totalorder %s356_s15, %s356_s15 }
  0x27   : > { %p2400_p13 = scmp.lt.s32.totalorder %s2391_s11, %s2391_s11 }
  0x28   : > { %p2394_p10 = pnand %p2392_p7, %p2356_p9 }
  0x29   : > { %p2401_p0 = por %p2400_p13, %p2399_p12 }
  0x2a   : > { %p2395_p11 = pneg %p2394_p10 }
  0x2b   : > { %2258 = dma.hbm_to_vmem [thread:$0]  (!%p2671_p8), %s3133_s3, 1024, %s343_s12, [#allocation5], %s3114_s17, %s3114_s17, %s3115_s25  }
  0x2c   : > { %p2402_p3 = pnand %p2401_p0, %p2395_p11 }
  0x2e   : > { %2405 = shalt.err (!%p2402_p3)
}
  0x2f   : > { %s3134_s4 = sld [smem:[#allocation20_spill]]  ;;  %s2540_s12 = smov [#allocation7]  }
  0x30   : > { %s368_s30 = sshll.u32 %s2540_s12, 4  ;;  %s369_s30 = int_to_ptr.vmem [resolvable:$true] %s368_s30 }
  0x31   : > { %s2417_s14 = scalar_lea.vmem %s369_s30, 1024  ;;  %p2425_p11 = scmp.lt.s32.totalorder %s369_s30, %s369_s30 }
  0x32   : > { %p2418_p4 = scmp.ne.s32.totalorder %s369_s30, %s2417_s14  ;;  %p2426_p12 = scmp.lt.s32.totalorder %s2417_s14, %s2417_s14 }
  0x34   : > { %p2420_p7 = pnand %p2418_p4, %p2356_p9  ;;  %p2427_p13 = por %p2426_p12, %p2425_p11 }
  0x35   : > { %2261 = dma.hbm_to_vmem [thread:$0]  (!%p2671_p8), %s3134_s4, 1024, %s356_s15, [#allocation5], %s3114_s17, %s3114_s17, %s3115_s25  }
  0x36   : > { %p2421_p10 = pneg %p2420_p7 }
  0x38   : > { %p2428_p0 = pnand %p2427_p13, %p2421_p10 }
  0x3a   : > { %2431 = shalt.err (!%p2428_p0)
}
  0x3b   : > { %s3135_s5 = sld [smem:[#allocation21_spill]]  ;;  %s36_s15 = sadd.s32 1, %s2526_s22 }
  0x3c   : > { %s39_s13 = sadd.s32 1, %s2530_s23  ;;  %p37_p9 = scmp.ge.s32.totalorder %s36_s15, 2 }
  0x3d   : > { %s48_s16 = sadd.s32 1, %s2514_s19  ;;  %p55_p3 = scmp.ne.s32.totalorder %s2514_s19, %s2510_s18 }
  0x3e   : > { %p56_p4 = scmp.eq.s32.totalorder %s2534_s24, 0  ;;  %s3169_s15 = smov (%p37_p9, %s36_s15), 0 }
  0x3f   : > { %3136 = sst [smem:[#allocation17_spill]] %s3169_s15  ;;  %s3171_s13 = smov (!%p37_p9, %s39_s13), %s2530_s23 }
  0x40   : > { %s44_s12 = ssub.s32 %s2526_s22, %s3169_s15  ;;  %p2721_p7 = por %p56_p4, %p55_p3 }
  0x41   : > { %2264 = dma.hbm_to_vmem [thread:$0]  (!%p2671_p8), %s3135_s5, 1024, %s369_s30, [#allocation8], %s3114_s17, %s3114_s17, %s3115_s25  }
  0x42   : > { %p41_p8 = scmp.ge.s32.totalorder %s3171_s13, 2  ;;  %p2727_p10 = por %p2651_p2, %p55_p3 }
  0x43   : > { %p2272_p11 = scmp.lt.s32.totalorder %s2534_s24, 4  ;;  %s391_s10 = sand.u32 1, %s2514_s19  }
  0x44   : > { %s3138_s30 = scalar_select %p2727_p10, 1, 0 }
  0x45   : > { %s3173_s13 = smov (%p41_p8, %s3171_s13), 0  ;;  %s2105_s11 = sshll.u32 %s391_s10, 4 }
  0x46   : > { %3139 = sst [smem:[#allocation18_spill]] %s3138_s30  ;;  %s43_s17 = ssub.s32 %s2530_s23, %s3173_s13 }
  0x47   : > { %s45_s25 = sor.u32 %s44_s12, %s43_s17  ;;  %s2106_s3 = sshll.u32 %s2526_s22, 1 }
  0x48   : > { %p46_p12 = scmp.eq.s32.totalorder %s45_s25, 0  ;;  %s2107_s4 = sshll.u32 %s2530_s23, 2 }
  0x49   : > { %s401_s5 = sadd.s32 %s2107_s4, %s2106_s3  ;;  %s395_s15 = scalar_lea.vmem [#allocation2], %s2105_s11 }
  0x4a   : > { %s404_s27 = sshll.u32 %s395_s15, 4  ;;  %s2108_s21 = sshll.u32 %s401_s5, 7  ;;  %s405_s27 = int_to_ptr.vmem [resolvable:$true] %s404_s27 }
  0x4b   : > { %s2740_s9 = scalar_select %p46_p12, %s2514_s19, %s48_s16  }
  0x4c   : > { %s403_s8 = scalar_lea.hbm %s3102_s0, %s2108_s21  ;;  %p2749_p2 = pnand %p2272_p11, %p2721_p7 }
  0x4d   : > { %s392_s17 = scalar_lea.sflag [#allocation3], %s391_s10  ;;  %s2445_s3 = scalar_lea.vmem %s405_s27, 256 }
  0x4e   : > { %p2434_p13 = pneg %p2749_p2  ;;  %p2446_p0 = scmp.ne.s32.totalorder %s405_s27, %s2445_s3 }
  0x4f   : > { %s2541_s4 = smov [#allocation2]  }
  0x50   : > { %p2448_p9 = pnand %p2446_p0, %p2434_p13  ;;  %s2450_s5 = sshll.u32 %s2541_s4, 4  ;;  %s2451_s5 = int_to_ptr.vmem [resolvable:$false] %s2450_s5 }
  0x51   : > { %s2452_s25 = scalar_lea.vmem %s2451_s5, 512  ;;  %p2453_p4 = scmp.lt.s32.totalorder %s405_s27, %s2451_s5 }
  0x52   : > { %p2449_p3 = pneg %p2448_p9  ;;  %p2454_p8 = scmp.lt.s32.totalorder %s2452_s25, %s2445_s3 }
  0x54   : > { %p2455_p12 = por %p2454_p8, %p2453_p4 }
  0x56   : > { %p2456_p10 = pnand %p2455_p12, %p2449_p3 }
  0x58   : > { %2459 = shalt.err (!%p2456_p10)
}
  0x59   : > { %s3141_s20 = smov 8   ;;  %s3142_s21 = smov 128  }
  0x5a   : > { %2268 = dma.hbm_to_vmem [thread:$0]  (!%p2749_p2), %s403_s8, 256, %s405_s27, %s392_s17, %s3142_s21, %s3142_s21, %s3141_s20  }
  0x5b   : > { %416 = sbr.rel (%p2663_p6) target bundleno = 843 (0x34b), region = 56  ;;  %s2763_s15 = sand.u32 (!%p2663_p6), 1, %s2510_s18  }
  0x5c   : > { %s2110_s16 = sshll.u32 (!%p2663_p6), %s2763_s15, 4  ;;  %s419_s12 = scalar_lea.sflag (!%p2663_p6), [#allocation3], %s2763_s15 }
  0x5d   : > { %s422_s14 = scalar_lea.vmem (!%p2663_p6), [#allocation2], %s2110_s16 }
  0x60   : > { %2493 = dma.done.wait (%p2659_p5), %s419_s12, 256  }
  0x61   : > { %2495 = vsyncadd (%p2659_p5), %s419_s12, 4294967040 }
  0x62   : > { %2497 = dma.done.wait (%p2647_p1), [#allocation5], 2048  }
  0x63   : > { %2499 = vsyncadd (%p2647_p1), [#allocation5], 4294965248 }
  0x64   : > { %2501 = dma.done.wait (%p2647_p1), [#allocation8], 1024  }
  0x65   : > { %2503 = vsyncadd (%p2647_p1), [#allocation8], 4294966272  ;;  %vm488_vm0 = vcmask 523264   ;;  %v484_v0 = vld [vmem:[%s422_s14] sm:$0xff]  ;;  %v485_v1 = vld [vmem:[%s422_s14 + $0x8] sm:$0xff]  ;;  %s2542_s10 = smov 112  }
  0x66   : > { %v489_v2 = vsel %vm488_vm0, %v484_v0, 0.0  ;;  %v492_v3 = vsel %vm488_vm0, %v485_v1, 0.0  ;;  %v539_v14 = vld [vmem:[#allocation4 + $0x38] sm:$0xff]  ;;  %v538_v16 = vld [vmem:[#allocation4 + $0x30] sm:$0xff]  ;;  %v537_v18 = vld [vmem:[#allocation4 + $0x28] sm:$0xff]  ;;  %s2543_s11 = smov 96  }
  0x67   : > { %490 = vadd.xlane.f32.xlu0 %v489_v2  ;;  %v936_v15 = vld [vmem:[#allocation6 + $0x38] sm:$0xff]  ;;  %2184 = vmatprep.subr.mxu0 %v539_v14  ;;  %v935_v17 = vld [vmem:[#allocation6 + $0x30] sm:$0xff]  ;;  %v934_v19 = vld [vmem:[#allocation6 + $0x28] sm:$0xff]  ;;  %s2544_s27 = smov 80   ;;  %s3143_s4 = sld [smem:[#allocation22_spill]]  ;;  %vm920_vm1 = vcmask 130048  }
  0x68   : > { %2203 = vmatprep.subr.mxu1 %v936_v15  ;;  %2185 = vmatpush3.msra.mxu0 %v539_v14  ;;  %v536_v20 = vld [vmem:[#allocation4 + $0x20] sm:$0xff]  ;;  %v535_v22 = vld [vmem:[#allocation4 + $0x18] sm:$0xff]  ;;  %v534_v24 = vld [vmem:[#allocation4 + $0x10] sm:$0xff]  ;;  %s3144_s20 = sld [smem:[#allocation23_spill]]  ;;  %s2872_s21 = sshll.u32 %s2763_s15, 6 }
  0x69   : > { %2204 = vmatpush3.msra.mxu1 %v936_v15  ;;  %2186 = vmatprep.subr.mxu0 %v538_v16  ;;  %v933_v21 = vld [vmem:[#allocation6 + $0x20] sm:$0xff]  ;;  %v932_v23 = vld [vmem:[#allocation6 + $0x18] sm:$0xff]  ;;  %v931_v25 = vld [vmem:[#allocation6 + $0x10] sm:$0xff]  ;;  %s2889_s15 = scalar_lea.vmem [#allocation9], %s2872_s21  ;;  %s2926_s16 = scalar_lea.vmem [#allocation10], %s2872_s21 }
  0x6a   : > { %2205 = vmatprep.subr.mxu1 %v935_v17  ;;  %2187 = vmatpush3.msra.mxu0 %v538_v16  ;;  %v533_v26 = vld [vmem:[#allocation4 + $0x8] sm:$0xff]  ;;  %v532_v28 = vld [vmem:[#allocation4] sm:$0xff]  ;;  %v1326_v30 = vld [vmem:[#allocation7 + $0x38] sm:$0xff]  ;;  %s3007_s12 = scalar_lea.vmem [#allocation11], %s2872_s21  ;;  %s3145_s14 = sld [smem:[#allocation18_spill]] }
  0x6b   : > { %493 = vadd.xlane.f32.xlu0 %v492_v3  ;;  %2206 = vmatpush3.msra.mxu1 %v935_v17  ;;  %v930_v27 = vld [vmem:[#allocation6 + $0x8] sm:$0xff]  ;;  %v929_v29 = vld [vmem:[#allocation6] sm:$0xff]  ;;  %v1325_v47 = vld [vmem:[#allocation7 + $0x30] sm:$0xff] }
  0x6c   : > { %2188 = vmatprep.subr.mxu0 %v537_v18  ;;  %2207 = vmatprep.subr.mxu1 %v934_v19  ;;  %v2117_v38 = vld [vmem:[%s3103_s1] ss:$0 sm:$0xff]  ;;  %v1324_v48 = vld [vmem:[#allocation7 + $0x28] sm:$0xff]  ;;  %v1322_v50 = vld [vmem:[#allocation7 + $0x18] sm:$0xff] }
  0x6d   : > { %2189 = vmatpush3.msra.mxu0 %v537_v18  ;;  %2208 = vmatpush3.msra.mxu1 %v934_v19  ;;  %v2118_v40 = vld [vmem:[%s3104_s2] ss:$0 sm:$0xff]  ;;  %v1321_v51 = vld [vmem:[#allocation7 + $0x10] sm:$0xff]  ;;  %v1320_v52 = vld [vmem:[#allocation7 + $0x8] sm:$0xff] }
  0x6e   : > { %2190 = vmatprep.subr.mxu0 %v536_v20  ;;  %2209 = vmatprep.subr.mxu1 %v933_v21  ;;  %v1323_v49 = vld [vmem:[#allocation7 + $0x20] sm:$0xff] }
  0x6f   : > { %2191 = vmatpush3.msra.mxu0 %v536_v20  ;;  %2210 = vmatpush3.msra.mxu1 %v933_v21  ;;  %v1319_v53 = vld [vmem:[#allocation7] sm:$0xff] }
  0x70   : > { %2192 = vmatprep.subr.mxu0 %v535_v22  ;;  %2211 = vmatprep.subr.mxu1 %v932_v23  ;;  %v2119_v54 = vld [vmem:[%s3108_s6] ss:$0 sm:$0xff]  ;;  %p3146_p1 = scmp.ne.s32.totalorder %s3145_s14, 0 }
  0x71   : > { %2193 = vmatpush3.msra.mxu0 %v535_v22  ;;  %2212 = vmatpush3.msra.mxu1 %v932_v23  ;;  %v2126_v61 = vld [vmem:[%s3143_s4] ss:$0 sm:$0xff]  ;;  %s3147_s7 = sld [smem:[#allocation15_spill]] (%p3146_p1) }
  0x72   : > { %2194 = vmatprep.subr.mxu0 %v534_v24  ;;  %2213 = vmatprep.subr.mxu1 %v931_v25  ;;  %v2133_v2 = vld [vmem:[%s3144_s20] ss:$0 sm:$0xff]  ;;  %s3148_s8 = sld [smem:[#allocation16_spill]] (%p3146_p1) }
  0x73   : > { %2195 = vmatpush3.msra.mxu0 %v534_v24  ;;  %2214 = vmatpush3.msra.mxu1 %v931_v25 }
  0x74   : > { %2196 = vmatprep.subr.mxu0 %v533_v26  ;;  %2215 = vmatprep.subr.mxu1 %v930_v27 }
  0x75   : > { %2197 = vmatpush3.msra.mxu0 %v533_v26  ;;  %2216 = vmatpush3.msra.mxu1 %v930_v27 }
  0x76   : > { %2198 = vmatprep.subr.mxu0 %v532_v28  ;;  %2217 = vmatprep.subr.mxu1 %v929_v29 }
  0x77   : > { %2199 = vmatpush3.msra.mxu0 %v532_v28  ;;  %2218 = vmatpush3.msra.mxu1 %v929_v29  ;;  %s2143_s26 = sshll.u32 (%p3146_p1), %s3147_s7, 1 }
  0x78   : > { %2222 = vmatprep.subr.mxu0 %v1326_v30  ;;  %s2144_s28 = sshll.u32 (%p3146_p1), %s3148_s8, 4 }
  0x79   : > { %s1726_s29 = sadd.s32 (%p3146_p1), %s2144_s28, %s2143_s26 }
  0x7a   : > { %s2145_s30 = sshll.u32 (%p3146_p1), %s1726_s29, 3 }
  0xf0   : > { %v491_v4 = vpop.xlane.xlu0 %490 }
  0xf1   : > { %v496_v5 = vmul.f32 0.015625, %v491_v4 }
  0xf3   : > { %v2781_v6 = vsub.f32 %v484_v0, %v496_v5  ;;  %v2545_v5 = vmov 1983009808  }
  0xf4   : > { %v494_v7 = vpop.xlane.xlu0 %493 }
  0xf5   : > { %v497_v8 = vmul.f32 0.015625, %v494_v7  ;;  %v500_v9 = vmul.f32 %v2781_v6, %v2781_v6  ;;  %v653_v7 = vlaneseq }
  0xf7   : > { %v2785_v10 = vsub.f32 %v485_v1, %v497_v8  ;;  %v502_v11 = vsel %vm488_vm0, %v500_v9, 0.0 }
  0xf8   : > { %503 = vadd.xlane.f32.xlu1 %v502_v11 }
  0xf9   : > { %v501_v12 = vmul.f32 %v2785_v10, %v2785_v10 }
  0xfb   : > { %v505_v13 = vsel %vm488_vm0, %v501_v12, 0.0 }
  0xfc   : > { %506 = vadd.xlane.f32.xlu1 %v505_v13  ;;  %v654_v13 = vshrl.u32 %v653_v7, 7 }
 0x181   : > { %v504_v31 = vpop.xlane.xlu1 %503 }
 0x182   : > { %v508_v32 = vmul.f32 0.015625, %v504_v31 }
 0x184   : > { %v510_v33 = vadd.f32 1e-05, %v508_v32 }
 0x185   : > { %v507_v34 = vpop.xlane.xlu1 %506 }
 0x186   : > { %2350 = vrsqrt.f32 %v510_v33  ;;  %v509_v35 = vmul.f32 0.015625, %v507_v34 }
 0x188   : > { %v511_v36 = vadd.f32 1e-05, %v509_v35 }
 0x18a   : > { %2352 = vrsqrt.f32 %v511_v36 }
 0x193   : > { %v2351_v37 = vpop.eup %2350 }
 0x194   : > { %v514_v39 = vmul.f32 %v2351_v37, %v2781_v6  ;;  %v651_v6 = vunpack.c.l.s4 %v2545_v5 }
 0x196   : > { %v522_v41 = vmul.f32 %v2117_v38, %v514_v39  ;;  %v652_v12 = vunpack.c.0.s8 %v651_v6 }
 0x197   : > { %v2353_v42 = vpop.eup %2352 }
 0x198   : > { %v515_v43 = vmul.f32 %v2353_v42, %v2785_v10  ;;  %v530_v44 = vadd.f32 %v2118_v40, %v522_v41  ;;  %v2546_v10 = vmov 1934713408   ;;  %v2839_v17 = vsub.s32 %v652_v12, %v654_v13 }
 0x199   : > { %v683_v11 = vunpack.c.l.s4 %v2546_v10 }
 0x19a   : > { %v523_v45 = vmul.f32 %v2117_v38, %v515_v43  ;;  %2200 = vmatprep.mubr.msk.f32.mxu0 %vm488_vm0, %v530_v44  ;;  %2219 = vmatprep.mubr.msk.f32.mxu1 %vm488_vm0, %v530_v44 }
 0x19b   : > { %v684_v16 = vunpack.c.0.s8 %v683_v11 }
 0x19c   : > { %v531_v46 = vadd.f32 %v2118_v40, %v523_v45 }
 0x19d   : > { %v2841_v23 = vsub.s32 %v684_v16, %v654_v13 }
 0x19e   : > { %2201 = vmatmul.mubr.msk.f32.vlgmr.msra.gmra.mxu0 %vm488_vm0, %v531_v46  ;;  %2220 = vmatmul.mubr.msk.f32.vlgmr.msra.gmra.mxu1 %vm488_vm0, %v531_v46 }
 0x19f   : > { %2223 = vmatpush3.msra.mxu0 %v1326_v30  ;;  %2238 = vmatprep.mubr.msk.f32.mxu0 %vm488_vm0, %v530_v44 }
 0x1a0   : > { %2224 = vmatprep.subr.mxu0 %v1325_v47 }
 0x1a1   : > { %2225 = vmatpush3.msra.mxu0 %v1325_v47 }
 0x1a2   : > { %2226 = vmatprep.subr.mxu0 %v1324_v48 }
 0x1a3   : > { %2227 = vmatpush3.msra.mxu0 %v1324_v48 }
 0x1a4   : > { %2228 = vmatprep.subr.mxu0 %v1323_v49 }
 0x1a5   : > { %2229 = vmatpush3.msra.mxu0 %v1323_v49 }
 0x1a6   : > { %2230 = vmatprep.subr.mxu0 %v1322_v50 }
 0x1a7   : > { %2231 = vmatpush3.msra.mxu0 %v1322_v50 }
 0x1a8   : > { %2232 = vmatprep.subr.mxu0 %v1321_v51 }
 0x1a9   : > { %2233 = vmatpush3.msra.mxu0 %v1321_v51 }
 0x1aa   : > { %2234 = vmatprep.subr.mxu0 %v1320_v52 }
 0x1ab   : > { %2235 = vmatpush3.msra.mxu0 %v1320_v52 }
 0x1ac   : > { %2236 = vmatprep.subr.mxu0 %v1319_v53 }
 0x1ad   : > { %2237 = vmatpush3.msra.mxu0 %v1319_v53 }
 0x1ae   : > { %2239 = vmatmul.mubr.msk.f32.vlgmr.msra.gmra.mxu0 %vm488_vm0, %v531_v46 }
 0x25e   : > { %v2202_v55 = vpop.f32.mrf.mxu0  ;;  %v2221_v59 = vpop.f32.mrf.mxu1 }
 0x25f   : > { %v625_v56 = vadd.f32 %v2202_v55, %v2119_v54  ;;  %v2817_v63 = vadd.f32 %v2221_v59, %v2126_v61 }
 0x260   : > { %v619_v57 = vpop.f32.mrf.mxu0  ;;  %v1010_v60 = vpop.f32.mrf.mxu1 }
 0x261   : > { %v2808_v58 = vadd.f32 %v2119_v54, %v619_v57  ;;  %632 = vrot.lane.b32.xlu1 %v625_v56, %s2542_s10  ;;  %v2815_v62 = vadd.f32 %v2126_v61, %v1010_v60 }
 0x263   : > { %630 = vrot.lane.b32.xlu0 %v2808_v58, %s2542_s10 }
 0x265   : > { %638 = vrot.lane.b32.xlu1 %v625_v56, %s2543_s11 }
 0x267   : > { %642 = vrot.lane.b32.xlu0 %v2808_v58, %s2544_s27 }
 0x269   : > { %644 = vrot.lane.b32.xlu1 %v625_v56, %s2544_s27 }
 0x26b   : > { %1021 = vrot.lane.b32.xlu0 %v2815_v62, %s2542_s10 }
 0x26d   : > { %1023 = vrot.lane.b32.xlu1 %v2817_v63, %s2542_s10 }
 0x26e   : > { %v2240_v0 = vpop.f32.mrf.mxu0 }
 0x26f   : > { %1027 = vrot.lane.b32.xlu0 %v2815_v62, %s2543_s11  ;;  %v2832_v4 = vadd.f32 %v2240_v0, %v2133_v2 }
 0x270   : > { %v1400_v1 = vpop.f32.mrf.mxu0 }
 0x271   : > { %1029 = vrot.lane.b32.xlu1 %v2817_v63, %s2543_s11  ;;  %v2827_v3 = vadd.f32 %v2133_v2, %v1400_v1 }
 0x273   : > { %1033 = vrot.lane.b32.xlu0 %v2815_v62, %s2544_s27 }
 0x275   : > { %1035 = vrot.lane.b32.xlu1 %v2817_v63, %s2544_s27 }
 0x277   : > { %1411 = vrot.lane.b32.xlu0 %v2827_v3, %s2542_s10 }
 0x279   : > { %636 = vrot.lane.b32.xlu1 %v2808_v58, %s2543_s11 }
 0x27b   : > { %1417 = vrot.lane.b32.xlu0 %v2827_v3, %s2543_s11 }
 0x27d   : > { %1413 = vrot.lane.b32.xlu1 %v2832_v4, %s2542_s10 }
 0x27f   : > { %1423 = vrot.lane.b32.xlu0 %v2827_v3, %s2544_s27 }
 0x281   : > { %1419 = vrot.lane.b32.xlu1 %v2832_v4, %s2543_s11 }
 0x285   : > { %1425 = vrot.lane.b32.xlu1 %v2832_v4, %s2544_s27  ;;  %s3149_s27 = sld [smem:[#allocation24_spill]] (%p3146_p1) }
 0x28b   : > { %s1728_s17 = scalar_lea.vmem (%p3146_p1), %s3149_s27, %s2145_s30 }
 0x2d3   : > { %v633_v8 = vpop.permute.xlu1 %632 }
 0x2d5   : > { %v631_v9 = vpop.permute.xlu0 %630 }
 0x2d7   : > { %v639_v14 = vpop.permute.xlu1 %638 }
 0x2d8   : > { %v716_v18 = vcombine.low %v625_v56, %v639_v14  ;;  %v717_v19 = vcombine.high %v625_v56, %v639_v14 }
 0x2d9   : > { %v643_v15 = vpop.permute.xlu0 %642 }
 0x2da   : > { %v724_v25 = vrot.slane %v716_v18, %v2839_v17  ;;  %v731_v26 = vrot.slane %v717_v19, %v2839_v17  ;;  %v664_v29 = vcombine.low %v631_v9, %v643_v15  ;;  %v665_v30 = vcombine.high %v631_v9, %v643_v15 }
 0x2db   : > { %v645_v20 = vpop.permute.xlu1 %644 }
 0x2dc   : > { %v732_v21 = vcombine.low %v633_v8, %v645_v20  ;;  %v733_v22 = vcombine.high %v633_v8, %v645_v20  ;;  %v2854_v41 = vrot.slane %v664_v29, %v2839_v17  ;;  %v2857_v42 = vrot.slane %v665_v30, %v2839_v17 }
 0x2dd   : > { %v1022_v24 = vpop.permute.xlu0 %1021 }
 0x2de   : > { %v740_v27 = vrot.slane %v732_v21, %v2839_v17  ;;  %v747_v28 = vrot.slane %v733_v22, %v2839_v17 }
 0x2df   : > { %v2847_v31 = vpop.permute.xlu1 %1023 }
 0x2e0   : > { %v748_v32 = vcombine.low %v724_v25, %v740_v27  ;;  %v749_v33 = vcombine.high %v724_v25, %v740_v27  ;;  %v764_v34 = vcombine.low %v731_v26, %v747_v28  ;;  %v765_v35 = vcombine.high %v731_v26, %v747_v28 }
 0x2e1   : > { %v1028_v36 = vpop.permute.xlu0 %1027 }
 0x2e2   : > { %v756_v37 = vrot.slane %v748_v32, %v2841_v23  ;;  %v763_v38 = vrot.slane %v749_v33, %v2841_v23  ;;  %v772_v39 = vrot.slane %v764_v34, %v2841_v23  ;;  %v779_v40 = vrot.slane %v765_v35, %v2841_v23 }
 0x2e3   : > { %v1039_v43 = vcombine.low %v2815_v62, %v1028_v36  ;;  %v1040_v44 = vcombine.high %v2815_v62, %v1028_v36  ;;  %v1030_v45 = vpop.permute.xlu1 %1029 }
 0x2e4   : > { %v852_v46 = vcombine.low %v756_v37, %v763_v38  ;;  %v2124_v47 = vcombine.high %v756_v37, %v763_v38  ;;  %v868_v48 = vcombine.low %v772_v39, %v779_v40  ;;  %v2125_v49 = vcombine.high %v772_v39, %v779_v40 }
 0x2e5   : > { %v1047_v50 = vrot.slane %v1039_v43, %v2839_v17  ;;  %v1054_v51 = vrot.slane %v1040_v44, %v2839_v17  ;;  %v1107_v52 = vcombine.low %v2817_v63, %v1030_v45  ;;  %v1108_v53 = vcombine.high %v2817_v63, %v1030_v45  ;;  %v1034_v54 = vpop.permute.xlu0 %1033 }
 0x2e6   : > { %v859_v55 = vrot.slane %v852_v46, %v2839_v17  ;;  %v867_v56 = vrot.slane %v2124_v47, %v2839_v17  ;;  %v875_v57 = vrot.slane %v868_v48, %v2839_v17  ;;  %v883_v59 = vrot.slane %v2125_v49, %v2839_v17 }
 0x2e7   : > { %v1115_v60 = vrot.slane %v1107_v52, %v2839_v17  ;;  %v1122_v61 = vrot.slane %v1108_v53, %v2839_v17  ;;  %v1055_v62 = vcombine.low %v1022_v24, %v1034_v54  ;;  %v1056_v0 = vcombine.high %v1022_v24, %v1034_v54  ;;  %v1036_v1 = vpop.permute.xlu1 %1035 }
 0x2e8   : > { %v884_v2 = vcombine.low %v859_v55, %v867_v56  ;;  %v885_v63 = vcombine.high %v859_v55, %v867_v56  ;;  %v900_v5 = vcombine.low %v875_v57, %v883_v59  ;;  %v901_v6 = vcombine.high %v875_v57, %v883_v59 }
 0x2e9   : > { %v1063_v7 = vrot.slane %v1055_v62, %v2839_v17  ;;  %v1070_v8 = vrot.slane %v1056_v0, %v2839_v17  ;;  %v1123_v9 = vcombine.low %v2847_v31, %v1036_v1  ;;  %v1124_v10 = vcombine.high %v2847_v31, %v1036_v1  ;;  %v2905_v38 = vpop.permute.xlu0 %1411 }
 0x2ea   : > { %v892_v11 = vrot.slane %v884_v2, %v2841_v23  ;;  %v899_v12 = vrot.slane %v885_v63, %v2841_v23  ;;  %v908_v13 = vrot.slane %v900_v5, %v2841_v23  ;;  %v915_v14 = vrot.slane %v901_v6, %v2841_v23 }
 0x2eb   : > { %v1071_v15 = vcombine.low %v1047_v50, %v1063_v7  ;;  %v1072_v16 = vcombine.high %v1047_v50, %v1063_v7  ;;  %v1087_v18 = vcombine.low %v1054_v51, %v1070_v8  ;;  %v1088_v19 = vcombine.high %v1054_v51, %v1070_v8  ;;  %v2882_v20 = vpop.permute.xlu1 %636 }
 0x2ec   : > { %v916_v21 = vcombine.low %v892_v11, %v908_v13  ;;  %v917_v22 = vcombine.high %v892_v11, %v908_v13  ;;  %v918_v24 = vcombine.low %v899_v12, %v915_v14  ;;  %v919_v25 = vcombine.high %v899_v12, %v915_v14 }
 0x2ed   : > { %v1079_v26 = vrot.slane %v1071_v15, %v2841_v23  ;;  %v1086_v27 = vrot.slane %v1072_v16, %v2841_v23  ;;  %v1095_v28 = vrot.slane %v1087_v18, %v2841_v23  ;;  %v1102_v29 = vrot.slane %v1088_v19, %v2841_v23  ;;  %v1418_v2 = vpop.permute.xlu0 %1417 }
 0x2ee   : > { %922 = vst.msk [vmem:[%s2889_s15 + $0x8] sm:$0xff] %vm920_vm1, %v916_v21  ;;  %924 = vst.msk [vmem:[%s2889_s15 + $0x18] sm:$0xff] %vm920_vm1, %v917_v22  ;;  %v1131_v30 = vrot.slane %v1123_v9, %v2839_v17  ;;  %v1138_v31 = vrot.slane %v1124_v10, %v2839_v17  ;;  %v648_v32 = vcombine.low %v2808_v58, %v2882_v20 }
 0x2ef   : > { %926 = vst.msk [vmem:[%s2889_s15 + $0x28] sm:$0xff] %vm920_vm1, %v918_v24  ;;  %928 = vst.msk [vmem:[%s2889_s15 + $0x38] sm:$0xff] %vm920_vm1, %v919_v25  ;;  %v649_v33 = vcombine.high %v2808_v58, %v2882_v20  ;;  %v1175_v34 = vcombine.low %v1079_v26, %v1086_v27  ;;  %v2129_v35 = vcombine.high %v1079_v26, %v1086_v27  ;;  %v2923_v12 = vpop.permute.xlu1 %1413 }
 0x2f0   : > { %v1191_v36 = vcombine.low %v1095_v28, %v1102_v29  ;;  %v2130_v37 = vcombine.high %v1095_v28, %v1102_v29  ;;  %v1139_v39 = vcombine.low %v1115_v60, %v1131_v30  ;;  %v1140_v40 = vcombine.high %v1115_v60, %v1131_v30 }
 0x2f1   : > { %v1155_v43 = vcombine.low %v1122_v61, %v1138_v31  ;;  %v1156_v44 = vcombine.high %v1122_v61, %v1138_v31  ;;  %v1182_v45 = vrot.slane %v1175_v34, %v2839_v17  ;;  %v1190_v46 = vrot.slane %v2129_v35, %v2839_v17  ;;  %v1424_v30 = vpop.permute.xlu0 %1423 }
 0x2f2   : > { %v1198_v47 = vrot.slane %v1191_v36, %v2839_v17  ;;  %v1206_v48 = vrot.slane %v2130_v37, %v2839_v17  ;;  %v1147_v58 = vrot.slane %v1139_v39, %v2841_v23  ;;  %v1154_v49 = vrot.slane %v1140_v40, %v2841_v23 }
 0x2f3   : > { %v1163_v50 = vrot.slane %v1155_v43, %v2841_v23  ;;  %v1170_v51 = vrot.slane %v1156_v44, %v2841_v23  ;;  %v1207_v52 = vcombine.low %v1182_v45, %v1190_v46  ;;  %v1208_v53 = vcombine.high %v1182_v45, %v1190_v46  ;;  %v1420_v40 = vpop.permute.xlu1 %1419 }
 0x2f4   : > { %v1223_v54 = vcombine.low %v1198_v47, %v1206_v48  ;;  %v1224_v55 = vcombine.high %v1198_v47, %v1206_v48  ;;  %v1243_v56 = vcombine.low %v1147_v58, %v1154_v49  ;;  %v2131_v57 = vcombine.high %v1147_v58, %v1154_v49 }
 0x2f5   : > { %v1259_v59 = vcombine.low %v1163_v50, %v1170_v51  ;;  %v2132_v60 = vcombine.high %v1163_v50, %v1170_v51  ;;  %v1215_v61 = vrot.slane %v1207_v52, %v2841_v23  ;;  %v1222_v62 = vrot.slane %v1208_v53, %v2841_v23 }
 0x2f6   : > { %v1231_v0 = vrot.slane %v1223_v54, %v2841_v23  ;;  %v1238_v1 = vrot.slane %v1224_v55, %v2841_v23  ;;  %v1250_v63 = vrot.slane %v1243_v56, %v2839_v17  ;;  %v1258_v5 = vrot.slane %v2131_v57, %v2839_v17 }
 0x2f7   : > { %v1266_v6 = vrot.slane %v1259_v59, %v2839_v17  ;;  %v1274_v7 = vrot.slane %v2132_v60, %v2839_v17  ;;  %v656_v18 = vrot.slane %v648_v32, %v2839_v17  ;;  %v663_v19 = vrot.slane %v649_v33, %v2839_v17 }
 0x2f8   : > { %v1239_v8 = vcombine.low %v1215_v61, %v1231_v0  ;;  %v1240_v9 = vcombine.high %v1215_v61, %v1231_v0  ;;  %v1241_v10 = vcombine.low %v1222_v62, %v1238_v1  ;;  %v1242_v11 = vcombine.high %v1222_v62, %v1238_v1 }
 0x2f9   : > { %v1275_v13 = vcombine.low %v1250_v63, %v1258_v5  ;;  %v1276_v14 = vcombine.high %v1250_v63, %v1258_v5  ;;  %v1291_v15 = vcombine.low %v1266_v6, %v1274_v7  ;;  %v1292_v16 = vcombine.high %v1266_v6, %v1274_v7 }
 0x2fa   : > { %1311 = vst.msk [vmem:[%s2926_s16] sm:$0xff] %vm920_vm1, %v1239_v8  ;;  %1313 = vst.msk [vmem:[%s2926_s16 + $0x10] sm:$0xff] %vm920_vm1, %v1240_v9  ;;  %v1429_v20 = vcombine.low %v2827_v3, %v1418_v2  ;;  %v1430_v21 = vcombine.high %v2827_v3, %v1418_v2  ;;  %v680_v27 = vcombine.low %v656_v18, %v2854_v41 }
 0x2fb   : > { %1315 = vst.msk [vmem:[%s2926_s16 + $0x20] sm:$0xff] %vm920_vm1, %v1241_v10  ;;  %1317 = vst.msk [vmem:[%s2926_s16 + $0x30] sm:$0xff] %vm920_vm1, %v1242_v11  ;;  %v1283_v22 = vrot.slane %v1275_v13, %v2841_v23  ;;  %v1290_v24 = vrot.slane %v1276_v14, %v2841_v23  ;;  %v1299_v25 = vrot.slane %v1291_v15, %v2841_v23  ;;  %v1426_v14 = vpop.permute.xlu1 %1425 }
 0x2fc   : > { %v1306_v26 = vrot.slane %v1292_v16, %v2841_v23  ;;  %v681_v28 = vcombine.high %v656_v18, %v2854_v41  ;;  %v696_v29 = vcombine.low %v663_v19, %v2857_v42  ;;  %v697_v3 = vcombine.high %v663_v19, %v2857_v42 }
 0x2fd   : > { %v1307_v31 = vcombine.low %v1283_v22, %v1299_v25  ;;  %v1308_v32 = vcombine.high %v1283_v22, %v1299_v25  ;;  %v688_v35 = vrot.slane %v680_v27, %v2841_v23  ;;  %v1437_v41 = vrot.slane %v1429_v20, %v2839_v17 }
 0x2fe   : > { %v1309_v33 = vcombine.low %v1290_v24, %v1306_v26  ;;  %v1310_v34 = vcombine.high %v1290_v24, %v1306_v26  ;;  %v695_v36 = vrot.slane %v681_v28, %v2841_v23  ;;  %v704_v37 = vrot.slane %v696_v29, %v2841_v23 }
 0x2ff   : > { %v711_v39 = vrot.slane %v697_v3, %v2841_v23  ;;  %1312 = vst.msk [vmem:[%s2926_s16 + $0x8] sm:$0xff] %vm920_vm1, %v1307_v31  ;;  %1314 = vst.msk [vmem:[%s2926_s16 + $0x18] sm:$0xff] %vm920_vm1, %v1308_v32  ;;  %v1444_v42 = vrot.slane %v1430_v21, %v2839_v17  ;;  %v1445_v43 = vcombine.low %v2905_v38, %v1424_v30 }
 0x300   : > { %1316 = vst.msk [vmem:[%s2926_s16 + $0x28] sm:$0xff] %vm920_vm1, %v1309_v33  ;;  %1318 = vst.msk [vmem:[%s2926_s16 + $0x38] sm:$0xff] %vm920_vm1, %v1310_v34  ;;  %v1446_v44 = vcombine.high %v2905_v38, %v1424_v30  ;;  %v784_v45 = vcombine.low %v688_v35, %v695_v36  ;;  %v2122_v46 = vcombine.high %v688_v35, %v695_v36 }
 0x301   : > { %v800_v47 = vcombine.low %v704_v37, %v711_v39  ;;  %v2123_v48 = vcombine.high %v704_v37, %v711_v39  ;;  %v1453_v58 = vrot.slane %v1445_v43, %v2839_v17  ;;  %v1497_v50 = vcombine.low %v2832_v4, %v1420_v40 }
 0x302   : > { %v1460_v49 = vrot.slane %v1446_v44, %v2839_v17  ;;  %v1498_v51 = vcombine.high %v2832_v4, %v1420_v40  ;;  %v791_v52 = vrot.slane %v784_v45, %v2839_v17  ;;  %v799_v53 = vrot.slane %v2122_v46, %v2839_v17 }
 0x303   : > { %v807_v54 = vrot.slane %v800_v47, %v2839_v17  ;;  %v815_v38 = vrot.slane %v2123_v48, %v2839_v17  ;;  %v1461_v55 = vcombine.low %v1437_v41, %v1453_v58  ;;  %v1462_v56 = vcombine.high %v1437_v41, %v1453_v58 }
 0x304   : > { %v1477_v57 = vcombine.low %v1444_v42, %v1460_v49  ;;  %v1478_v59 = vcombine.high %v1444_v42, %v1460_v49  ;;  %v816_v60 = vcombine.low %v791_v52, %v799_v53  ;;  %v817_v61 = vcombine.high %v791_v52, %v799_v53 }
 0x305   : > { %v832_v62 = vcombine.low %v807_v54, %v815_v38  ;;  %v833_v0 = vcombine.high %v807_v54, %v815_v38  ;;  %v1469_v1 = vrot.slane %v1461_v55, %v2841_v23  ;;  %v1476_v4 = vrot.slane %v1462_v56, %v2841_v23 }
 0x306   : > { %v1485_v2 = vrot.slane %v1477_v57, %v2841_v23  ;;  %v1492_v63 = vrot.slane %v1478_v59, %v2841_v23  ;;  %v824_v5 = vrot.slane %v816_v60, %v2841_v23  ;;  %v831_v6 = vrot.slane %v817_v61, %v2841_v23 }
 0x307   : > { %v840_v7 = vrot.slane %v832_v62, %v2841_v23  ;;  %v847_v8 = vrot.slane %v833_v0, %v2841_v23  ;;  %v1565_v9 = vcombine.low %v1469_v1, %v1476_v4  ;;  %v2136_v10 = vcombine.high %v1469_v1, %v1476_v4 }
 0x308   : > { %v1581_v11 = vcombine.low %v1485_v2, %v1492_v63  ;;  %v2137_v13 = vcombine.high %v1485_v2, %v1492_v63  ;;  %v1513_v25 = vcombine.low %v2923_v12, %v1426_v14  ;;  %v1514_v26 = vcombine.high %v2923_v12, %v1426_v14 }
 0x309   : > { %v848_v15 = vcombine.low %v824_v5, %v840_v7  ;;  %v849_v16 = vcombine.high %v824_v5, %v840_v7  ;;  %v850_v18 = vcombine.low %v831_v6, %v847_v8  ;;  %v851_v19 = vcombine.high %v831_v6, %v847_v8  ;;  %v1777_v7 = vld [vmem:[%s2889_s15 + $0x18] sm:$0xff] (%p3146_p1) }
 0x30a   : > { %v1572_v20 = vrot.slane %v1565_v9, %v2839_v17  ;;  %v1580_v21 = vrot.slane %v2136_v10, %v2839_v17  ;;  %v1588_v22 = vrot.slane %v1581_v11, %v2839_v17  ;;  %v1596_v24 = vrot.slane %v2137_v13, %v2839_v17  ;;  %v1781_v9 = vld [vmem:[%s2889_s15 + $0x28] sm:$0xff] (%p3146_p1)  ;;  %v1785_v11 = vld [vmem:[%s2889_s15 + $0x38] sm:$0xff] (%p3146_p1)  ;;  %1778 = vst [vmem:[%s1728_s17 + $0x28] sm:$0xff] (%p3146_p1), %v1777_v7 }
 0x30b   : > { %921 = vst.msk [vmem:[%s2889_s15] sm:$0xff] %vm920_vm1, %v848_v15  ;;  %923 = vst.msk [vmem:[%s2889_s15 + $0x10] sm:$0xff] %vm920_vm1, %v849_v16  ;;  %v1505_v30 = vrot.slane %v1497_v50, %v2839_v17  ;;  %v1512_v31 = vrot.slane %v1498_v51, %v2839_v17  ;;  %v1521_v32 = vrot.slane %v1513_v25, %v2839_v17 }
 0x30c   : > { %925 = vst.msk [vmem:[%s2889_s15 + $0x20] sm:$0xff] %vm920_vm1, %v850_v18  ;;  %927 = vst.msk [vmem:[%s2889_s15 + $0x30] sm:$0xff] %vm920_vm1, %v851_v19  ;;  %v1597_v27 = vcombine.low %v1572_v20, %v1580_v21  ;;  %v1598_v28 = vcombine.high %v1572_v20, %v1580_v21  ;;  %v1613_v29 = vcombine.low %v1588_v22, %v1596_v24 }
 0x30d   : > { %v1614_v3 = vcombine.high %v1588_v22, %v1596_v24  ;;  %v1528_v33 = vrot.slane %v1514_v26, %v2839_v17  ;;  %v1529_v37 = vcombine.low %v1505_v30, %v1521_v32  ;;  %v1530_v39 = vcombine.high %v1505_v30, %v1521_v32  ;;  %1782 = vst [vmem:[%s1728_s17 + $0x48] sm:$0xff] (%p3146_p1), %v1781_v9 }
 0x30e   : > { %v1605_v34 = vrot.slane %v1597_v27, %v2841_v23  ;;  %v1612_v35 = vrot.slane %v1598_v28, %v2841_v23  ;;  %v1621_v36 = vrot.slane %v1613_v29, %v2841_v23  ;;  %1786 = vst [vmem:[%s1728_s17 + $0x68] sm:$0xff] (%p3146_p1), %v1785_v11 }
 0x30f   : > { %v1628_v12 = vrot.slane %v1614_v3, %v2841_v23  ;;  %v1545_v40 = vcombine.low %v1512_v31, %v1528_v33  ;;  %v1546_v41 = vcombine.high %v1512_v31, %v1528_v33  ;;  %v1537_v46 = vrot.slane %v1529_v37, %v2841_v23 }
 0x310   : > { %v1629_v42 = vcombine.low %v1605_v34, %v1621_v36  ;;  %v1630_v43 = vcombine.high %v1605_v34, %v1621_v36  ;;  %v1544_v47 = vrot.slane %v1530_v39, %v2841_v23 }
 0x311   : > { %v1631_v44 = vcombine.low %v1612_v35, %v1628_v12  ;;  %v1632_v45 = vcombine.high %v1612_v35, %v1628_v12  ;;  %v1553_v48 = vrot.slane %v1545_v40, %v2841_v23  ;;  %v1560_v58 = vrot.slane %v1546_v41, %v2841_v23 }
 0x312   : > { %1701 = vst.msk [vmem:[%s3007_s12] sm:$0xff] %vm920_vm1, %v1629_v42  ;;  %1703 = vst.msk [vmem:[%s3007_s12 + $0x10] sm:$0xff] %vm920_vm1, %v1630_v43  ;;  %v1633_v49 = vcombine.low %v1537_v46, %v1544_v47  ;;  %v2138_v50 = vcombine.high %v1537_v46, %v1544_v47  ;;  %v1775_v6 = vld [vmem:[%s2889_s15 + $0x10] sm:$0xff] (%p3146_p1) }
 0x313   : > { %1705 = vst.msk [vmem:[%s3007_s12 + $0x20] sm:$0xff] %vm920_vm1, %v1631_v44  ;;  %1707 = vst.msk [vmem:[%s3007_s12 + $0x30] sm:$0xff] %vm920_vm1, %v1632_v45  ;;  %v1649_v51 = vcombine.low %v1553_v48, %v1560_v58  ;;  %v2139_v52 = vcombine.high %v1553_v48, %v1560_v58  ;;  %v1779_v8 = vld [vmem:[%s2889_s15 + $0x20] sm:$0xff] (%p3146_p1)  ;;  %v1783_v10 = vld [vmem:[%s2889_s15 + $0x30] sm:$0xff] (%p3146_p1) }
 0x314   : > { %v1640_v53 = vrot.slane %v1633_v49, %v2839_v17  ;;  %v1648_v54 = vrot.slane %v2138_v50, %v2839_v17  ;;  %1776 = vst [vmem:[%s1728_s17 + $0x20] sm:$0xff] (%p3146_p1), %v1775_v6  ;;  %1780 = vst [vmem:[%s1728_s17 + $0x40] sm:$0xff] (%p3146_p1), %v1779_v8 }
 0x315   : > { %v1656_v38 = vrot.slane %v1649_v51, %v2839_v17  ;;  %v1664_v55 = vrot.slane %v2139_v52, %v2839_v17  ;;  %v1771_v17 = vld [vmem:[%s2889_s15] sm:$0xff] (%p3146_p1)  ;;  %1784 = vst [vmem:[%s1728_s17 + $0x60] sm:$0xff] (%p3146_p1), %v1783_v10 }
 0x316   : > { %v1665_v56 = vcombine.low %v1640_v53, %v1648_v54  ;;  %v1666_v57 = vcombine.high %v1640_v53, %v1648_v54  ;;  %1772 = vst [vmem:[%s1728_s17] sm:$0xff] (%p3146_p1), %v1771_v17 }
 0x317   : > { %v1681_v59 = vcombine.low %v1656_v38, %v1664_v55  ;;  %v1682_v60 = vcombine.high %v1656_v38, %v1664_v55 }
 0x318   : > { %v1673_v61 = vrot.slane %v1665_v56, %v2841_v23  ;;  %v1680_v62 = vrot.slane %v1666_v57, %v2841_v23 }
 0x319   : > { %v1689_v0 = vrot.slane %v1681_v59, %v2841_v23  ;;  %v1696_v1 = vrot.slane %v1682_v60, %v2841_v23  ;;  %v1773_v23 = vld [vmem:[%s2889_s15 + $0x8] sm:$0xff] (%p3146_p1) }
 0x31a   : > { %1723 = sbr.rel (!%p3146_p1) target bundleno = 799 (0x31f), region = 76  ;;  %1774 = vst [vmem:[%s1728_s17 + $0x8] sm:$0xff] (%p3146_p1), %v1773_v23 }
 0x31b   : > { %v1697_v4 = vcombine.low %v1673_v61, %v1689_v0  ;;  %v1698_v2 = vcombine.high %v1673_v61, %v1689_v0  ;;  %v1699_v63 = vcombine.low %v1680_v62, %v1696_v1  ;;  %v1700_v5 = vcombine.high %v1680_v62, %v1696_v1 }
 0x31d   : > { %1702 = vst.msk [vmem:[%s3007_s12 + $0x8] sm:$0xff] %vm920_vm1, %v1697_v4  ;;  %1704 = vst.msk [vmem:[%s3007_s12 + $0x18] sm:$0xff] %vm920_vm1, %v1698_v2 }
 0x31e   : > { %1706 = vst.msk [vmem:[%s3007_s12 + $0x28] sm:$0xff] %vm920_vm1, %v1699_v63  ;;  %1708 = vst.msk [vmem:[%s3007_s12 + $0x38] sm:$0xff] %vm920_vm1, %v1700_v5 }
 0x31f PF: > { %s3150_s3 = sld [smem:[#allocation18_spill]] }
 0x325   : > { %p3151_p5 = scmp.ne.s32.totalorder %s3150_s3, 0 }
 0x326   : > { %s3152_s4 = sld [smem:[#allocation15_spill]] (%p3151_p5)  ;;  %v1840_v13 = vld [vmem:[%s2926_s16] sm:$0xff] (%p3151_p5)  ;;  %v1842_v14 = vld [vmem:[%s2926_s16 + $0x8] sm:$0xff] (%p3151_p5)  ;;  %v1844_v15 = vld [vmem:[%s2926_s16 + $0x10] sm:$0xff] (%p3151_p5) }
 0x327   : > { %1792 = sbr.rel (!%p3151_p5) target bundleno = 821 (0x335), region = 114  ;;  %s3153_s5 = sld [smem:[#allocation16_spill]] (%p3151_p5)  ;;  %v1846_v16 = vld [vmem:[%s2926_s16 + $0x18] sm:$0xff] (%p3151_p5)  ;;  %v1848_v18 = vld [vmem:[%s2926_s16 + $0x20] sm:$0xff] (%p3151_p5)  ;;  %v1850_v19 = vld [vmem:[%s2926_s16 + $0x28] sm:$0xff] (%p3151_p5) }
 0x328   : > { %v1852_v20 = vld [vmem:[%s2926_s16 + $0x30] sm:$0xff] (%p3151_p5)  ;;  %v1854_v21 = vld [vmem:[%s2926_s16 + $0x38] sm:$0xff] (%p3151_p5)  ;;  %s3154_s8 = sld [smem:[#allocation25_spill]] (%p3151_p5) }
 0x32c   : > { %s2146_s25 = sshll.u32 %s3152_s4, 1 }
 0x32d   : > { %s2147_s20 = sshll.u32 %s3153_s5, 4 }
 0x32e   : > { %s1795_s21 = sadd.s32 %s2147_s20, %s2146_s25 }
 0x32f   : > { %s2148_s15 = sshll.u32 %s1795_s21, 3 }
 0x330   : > { %s1797_s26 = scalar_lea.vmem %s3154_s8, %s2148_s15 }
 0x331   : > { %1841 = vst [vmem:[%s1797_s26] sm:$0xff] %v1840_v13  ;;  %1843 = vst [vmem:[%s1797_s26 + $0x8] sm:$0xff] %v1842_v14 }
 0x332   : > { %1845 = vst [vmem:[%s1797_s26 + $0x20] sm:$0xff] %v1844_v15  ;;  %1847 = vst [vmem:[%s1797_s26 + $0x28] sm:$0xff] %v1846_v16 }
 0x333   : > { %1849 = vst [vmem:[%s1797_s26 + $0x40] sm:$0xff] %v1848_v18  ;;  %1851 = vst [vmem:[%s1797_s26 + $0x48] sm:$0xff] %v1850_v19 }
 0x334   : > { %1853 = vst [vmem:[%s1797_s26 + $0x60] sm:$0xff] %v1852_v20  ;;  %1855 = vst [vmem:[%s1797_s26 + $0x68] sm:$0xff] %v1854_v21 }
 0x335 PF: > { %s3155_s28 = sld [smem:[#allocation18_spill]] }
 0x33b   : > { %p3156_p6 = scmp.ne.s32.totalorder %s3155_s28, 0 }
 0x33c   : > { %s3157_s29 = sld [smem:[#allocation15_spill]] (%p3156_p6)  ;;  %v1909_v22 = vld [vmem:[%s3007_s12] sm:$0xff] (%p3156_p6)  ;;  %v1911_v24 = vld [vmem:[%s3007_s12 + $0x8] sm:$0xff] (%p3156_p6)  ;;  %v1913_v25 = vld [vmem:[%s3007_s12 + $0x10] sm:$0xff] (%p3156_p6) }
 0x33d   : > { %1861 = sbr.rel (!%p3156_p6) target bundleno = 843 (0x34b), region = 152  ;;  %s3158_s30 = sld [smem:[#allocation16_spill]] (%p3156_p6)  ;;  %v1915_v26 = vld [vmem:[%s3007_s12 + $0x18] sm:$0xff] (%p3156_p6)  ;;  %v1917_v27 = vld [vmem:[%s3007_s12 + $0x20] sm:$0xff] (%p3156_p6)  ;;  %v1919_v28 = vld [vmem:[%s3007_s12 + $0x28] sm:$0xff] (%p3156_p6) }
 0x33e   : > { %v1921_v29 = vld [vmem:[%s3007_s12 + $0x30] sm:$0xff] (%p3156_p6)  ;;  %v1923_v3 = vld [vmem:[%s3007_s12 + $0x38] sm:$0xff] (%p3156_p6)  ;;  %s3159_s4 = sld [smem:[#allocation26_spill]] (%p3156_p6) }
 0x342   : > { %s2149_s16 = sshll.u32 %s3157_s29, 1 }
 0x343   : > { %s2150_s10 = sshll.u32 %s3158_s30, 4 }
 0x344   : > { %s1864_s11 = sadd.s32 %s2150_s10, %s2149_s16 }
 0x345   : > { %s2151_s27 = sshll.u32 %s1864_s11, 3 }
 0x346   : > { %s1866_s5 = scalar_lea.vmem %s3159_s4, %s2151_s27 }
 0x347   : > { %1910 = vst [vmem:[%s1866_s5] sm:$0xff] %v1909_v22  ;;  %1912 = vst [vmem:[%s1866_s5 + $0x8] sm:$0xff] %v1911_v24 }
 0x348   : > { %1914 = vst [vmem:[%s1866_s5 + $0x20] sm:$0xff] %v1913_v25  ;;  %1916 = vst [vmem:[%s1866_s5 + $0x28] sm:$0xff] %v1915_v26 }
 0x349   : > { %1918 = vst [vmem:[%s1866_s5 + $0x40] sm:$0xff] %v1917_v27  ;;  %1920 = vst [vmem:[%s1866_s5 + $0x48] sm:$0xff] %v1919_v28 }
 0x34a   : > { %1922 = vst [vmem:[%s1866_s5 + $0x60] sm:$0xff] %v1921_v29  ;;  %1924 = vst [vmem:[%s1866_s5 + $0x68] sm:$0xff] %v1923_v3 }
 0x34b PF: > { %s27_s24 = sadd.s32 1, %s2534_s24   ;;  %s3160_s12 = sld [smem:[#allocation17_spill]] }
 0x34c   : > { %p24_p7 = scmp.ge.s32.totalorder %s27_s24, 6   ;;  %s3161_s17 = smov %s2510_s18 }
 0x34d   : > { %s3162_s18 = smov %s2514_s19  ;;  %s3163_s19 = smov %s2740_s9 }
 0x34e   : > { %s3164_s20 = smov %s2526_s22  ;;  %s3165_s21 = smov %s2530_s23 }
 0x34f   : > { %s3167_s23 = smov %s3173_s13  ;;  %26 = sbr.rel (!%p24_p7) target bundleno = 16 (0x10), region = 246 }
 0x351   : > { %s3166_s22 = smov %s3160_s12 }
 0x354   :  { %1954 = vsyncpa [#allocation3], 1 }
 0x355   :  { %1956 = vsyncpa [#allocation3 + $0x1], 1 }
 0x356   :  { %1957 = vsyncpa [#allocation5], 1 }
 0x357   :  { %1958 = vsyncpa [#allocation8], 1 }

</bundles_post_ra>
